<compile_context>
chip_gen: v6e
topology: v6e:2x2x1
jax: 0.10.0
libtpu: 0.0.40
codegen_flags: <defaults>
</compile_context>

<pallas_src>
import functools

import jax
import jax.numpy as jnp
from jax.experimental import pallas as pl
from jax.experimental.pallas import tpu as pltpu


def _round_up(a: int, b: int) -> int:
    return (a + b - 1) // b * b


def linear_kernel(x_ref, wt_ref, b_ref, o_ref, acc_ref):
    # y = x @ W^T + b  ==  x @ wt + b   with wt = W^T pre-transposed in wrapper.
    k = pl.program_id(2)

    @pl.when(k == 0)
    def _():
        acc_ref[...] = jnp.zeros_like(acc_ref)

    # f32 accumulate on the MXU; RHS is already lane-dense [tk, tn].
    acc_ref[...] += jnp.dot(
        x_ref[...], wt_ref[...], preferred_element_type=jnp.float32
    )

    # Epilogue only on the last K step: bias added exactly once, in f32,
    # then a single cast + lane-dense store of the output tile.
    @pl.when(k == pl.num_programs(2) - 1)
    def _():
        o_ref[...] = (acc_ref[...] + b_ref[...].astype(jnp.float32)).astype(
            o_ref.dtype
        )


@functools.partial(jax.jit, static_argnames=("tm", "tn", "tk"))
def linear(x, weight, bias, *, tm=256, tn=256, tk=512):
    """torch.nn.Linear forward: y = x @ weight.T + bias.

    Tiled (M, N, K) Pallas matmul with an f32 VMEM accumulator, bias added on
    the last K step, parallel M/N grid axes and tile sizes clamped/padded so
    tiny shapes (like the 4x4 toy Linear) still present lane-dense (>=128)
    blocks to the MXU and the store path.
    """
    B, IN = x.shape
    OUT = weight.shape[0]

    # Pre-transpose the weight once (outside the kernel) -> [IN, OUT].
    wt = weight.T

    # Clamp tiles to the (padded) problem size; keep (8, 128) alignment.
    tm = min(tm, _round_up(B, 8))
    tn = min(tn, _round_up(OUT, 128))
    tk = min(tk, _round_up(IN, 128))

    M_pad = _round_up(B, tm)
    N_pad = _round_up(OUT, tn)
    K_pad = _round_up(IN, tk)

    # Zero-pad: padded-K contributions are exactly zero, padded N columns and
    # padded M rows are sliced away, so semantics match torch.nn.Linear.
    x_p = jnp.pad(x, ((0, M_pad - B), (0, K_pad - IN)))
    wt_p = jnp.pad(wt, ((0, K_pad - IN), (0, N_pad - OUT)))
    b_p = jnp.pad(bias.reshape(1, OUT), ((0, 0), (0, N_pad - OUT)))

    grid = (M_pad // tm, N_pad // tn, K_pad // tk)

    itemsize = jnp.dtype(x.dtype).itemsize
    cost = pl.CostEstimate(
        flops=2 * M_pad * K_pad * N_pad,
        transcendentals=0,
        bytes_accessed=(
            M_pad * K_pad * itemsize
            + K_pad * N_pad * itemsize
            + N_pad * itemsize
            + M_pad * N_pad * itemsize
        ),
    )

    out_padded = pl.pallas_call(
        linear_kernel,
        out_shape=jax.ShapeDtypeStruct((M_pad, N_pad), x.dtype),
        grid_spec=pltpu.PrefetchScalarGridSpec(
            num_scalar_prefetch=0,
            grid=grid,
            in_specs=[
                pl.BlockSpec((tm, tk), lambda i, j, k: (i, k)),   # x tile
                pl.BlockSpec((tk, tn), lambda i, j, k: (k, j)),   # W^T tile
                pl.BlockSpec((1, tn), lambda i, j, k: (0, j)),    # bias tile
            ],
            out_specs=pl.BlockSpec((tm, tn), lambda i, j, k: (i, j)),
            scratch_shapes=[pltpu.VMEM((tm, tn), jnp.float32)],
        ),
        compiler_params=pltpu.CompilerParams(
            dimension_semantics=("parallel", "parallel", "arbitrary"),
            # Sized for v7x's smaller VMEM; also fine on v5e/v6e.
            vmem_limit_bytes=48 * 1024 * 1024,
        ),
        cost_estimate=cost,
    )(x_p, wt_p, b_p)

    return out_padded[:B, :OUT]


if __name__ == "__main__":
    key = jax.random.PRNGKey(0)
    kx, kw, kb = jax.random.split(key, 3)

    # Shapes implied by the module: fc = nn.Linear(4, 4); small batch of 8.
    B, IN, OUT = 8, 4, 4

    # Deterministic parameter init (mimics torch.nn.Linear uniform init range).
    bound = 1.0 / (IN ** 0.5)
    weight = jax.random.uniform(kw, (OUT, IN), jnp.float32, -bound, bound)
    bias = jax.random.uniform(kb, (OUT,), jnp.float32, -bound, bound)

    x = jax.random.normal(kx, (B, IN), jnp.float32)

    y = linear(x, weight, bias)
    y = jax.block_until_ready(y)

    # Reference check in plain JAX.
    y_ref = x @ weight.T + bias
    assert y.shape == y_ref.shape
    assert jnp.allclose(y, y_ref, atol=1e-5, rtol=1e-5), "mismatch vs reference"

    print("KERNEL_OK")
</pallas_src>

<mosaic_0001>
module attributes {stable_mosaic.version = 11 : i64} {
  func.func @linear_kernel(%arg0: i32, %arg1: i32, %arg2: i32, %arg3: memref<8x128xf32, #tpu.memory_space<vmem>>, %arg4: memref<128x128xf32, #tpu.memory_space<vmem>>, %arg5: memref<1x128xf32, #tpu.memory_space<vmem>>, %arg6: memref<8x128xf32, #tpu.memory_space<vmem>>, %arg7: memref<8x128xf32, #tpu.memory_space<vmem>>) attributes {dimension_semantics = [#tpu.dimension_semantics<parallel>, #tpu.dimension_semantics<parallel>, #tpu.dimension_semantics<arbitrary>], iteration_bounds = array<i64: 1, 1, 1>, scalar_prefetch = 0 : i64, scratch_operands = 1 : i64, tpu.core_type = #tpu.core_type<tc>, window_params = [{transform_indices = @transform_0, window_bounds = array<i64: 8, 128>}, {transform_indices = @transform_1, window_bounds = array<i64: 128, 128>}, {transform_indices = @transform_2, window_bounds = array<i64: 1, 128>}, {transform_indices = @transform_3, window_bounds = array<i64: 8, 128>}]} {
    %c0_i32 = arith.constant 0 : i32
    %0 = arith.cmpi eq, %arg2, %c0_i32 : i32
    %1 = arith.extui %0 : i1 to i32
    %c0_i32_0 = arith.constant 0 : i32
    %2 = arith.cmpi ne, %1, %c0_i32_0 : i32
    scf.if %2 {
      %cst_10 = arith.constant 0.000000e+00 : f32
      %12 = vector.broadcast %cst_10 : f32 to vector<8x128xf32>
      %c0_11 = arith.constant 0 : index
      %c0_12 = arith.constant 0 : index
      %13 = vector.load %arg7[%c0_11, %c0_12] : memref<8x128xf32, #tpu.memory_space<vmem>>, vector<8x128xf32>
      tpu.vector_store %arg7[%c0_11, %c0_12], %12 {strides = array<i32>} : memref<8x128xf32, #tpu.memory_space<vmem>>, vector<8x128xf32>,
    } else {
    }
    %c0 = arith.constant 0 : index
    %c0_1 = arith.constant 0 : index
    %3 = vector.load %arg7[%c0, %c0_1] : memref<8x128xf32, #tpu.memory_space<vmem>>, vector<8x128xf32>
    %c0_2 = arith.constant 0 : index
    %c0_3 = arith.constant 0 : index
    %4 = vector.load %arg3[%c0_2, %c0_3] : memref<8x128xf32, #tpu.memory_space<vmem>>, vector<8x128xf32>
    %c0_4 = arith.constant 0 : index
    %c0_5 = arith.constant 0 : index
    %5 = vector.load %arg4[%c0_4, %c0_5] : memref<128x128xf32, #tpu.memory_space<vmem>>, vector<128x128xf32>
    %cst = arith.constant dense<0.000000e+00> : vector<8x128xf32>
    %6 = tpu.matmul %4, %5, %cst {dimension_numbers = #tpu.dot_dimension_numbers<[1], [0], [0], [1], [0, 0, 1, 1], [], []>} : vector<8x128xf32>, vector<128x128xf32>, vector<8x128xf32> -> vector<8x128xf32>
    %7 = arith.addf %3, %6 : vector<8x128xf32>
    %c0_6 = arith.constant 0 : index
    %c0_7 = arith.constant 0 : index
    %8 = vector.load %arg7[%c0_6, %c0_7] : memref<8x128xf32, #tpu.memory_space<vmem>>, vector<8x128xf32>
    tpu.vector_store %arg7[%c0_6, %c0_7], %7 {strides = array<i32>} : memref<8x128xf32, #tpu.memory_space<vmem>>, vector<8x128xf32>,
    %c0_i32_8 = arith.constant 0 : i32
    %9 = arith.cmpi eq, %arg2, %c0_i32_8 : i32
    %10 = arith.extui %9 : i1 to i32
    %c0_i32_9 = arith.constant 0 : i32
    %11 = arith.cmpi ne, %10, %c0_i32_9 : i32
    scf.if %11 {
      %c0_10 = arith.constant 0 : index
      %c0_11 = arith.constant 0 : index
      %12 = vector.load %arg7[%c0_10, %c0_11] : memref<8x128xf32, #tpu.memory_space<vmem>>, vector<8x128xf32>
      %c0_12 = arith.constant 0 : index
      %c0_13 = arith.constant 0 : index
      %13 = vector.load %arg5[%c0_12, %c0_13] : memref<1x128xf32, #tpu.memory_space<vmem>>, vector<1x128xf32>
      %14 = vector.broadcast %13 : vector<1x128xf32> to vector<8x128xf32>
      %15 = arith.addf %12, %14 : vector<8x128xf32>
      %c0_14 = arith.constant 0 : index
      %c0_15 = arith.constant 0 : index
      %16 = vector.load %arg6[%c0_14, %c0_15] : memref<8x128xf32, #tpu.memory_space<vmem>>, vector<8x128xf32>
      tpu.vector_store %arg6[%c0_14, %c0_15], %15 {strides = array<i32>} : memref<8x128xf32, #tpu.memory_space<vmem>>, vector<8x128xf32>,
    } else {
    }
    return
  }
  func.func @transform_0(%arg0: i32, %arg1: i32, %arg2: i32) -> (i32, i32) {
    %c0_i32 = arith.constant 0 : i32
    return %arg0, %arg2 : i32, i32
  }
  func.func @transform_1(%arg0: i32, %arg1: i32, %arg2: i32) -> (i32, i32) {
    %c0_i32 = arith.constant 0 : i32
    return %arg2, %arg1 : i32, i32
  }
  func.func @transform_2(%arg0: i32, %arg1: i32, %arg2: i32) -> (i32, i32) {
    %c0_i32 = arith.constant 0 : i32
    %c0_i32_0 = arith.constant 0 : i32
    return %c0_i32, %arg1 : i32, i32
  }
  func.func @transform_3(%arg0: i32, %arg1: i32, %arg2: i32) -> (i32, i32) {
    %c0_i32 = arith.constant 0 : i32
    return %arg0, %arg1 : i32, i32
  }
}

</mosaic_0001>

<bundles_post_ra>
// kernel: linear.1
= control target key start
LH: loop header
LB: loop body
LE: loop exit
PB: predicated region body
PF: predicated region fallthrough
CT: control target
= control target key end

     0   :  { %v181_v0 = vmov 0.0   ;;  %vm182_vm0 = vmmov 0   ;;  %s260_s1 = inlined_call_operand.vmem [shape: f32[128,128], index: 1, kind: input, shape index: {}]   ;;  %s261_s0 = inlined_call_operand.vmem [shape: f32[8,128], index: 0, kind: input, shape index: {}]   ;;  %s262_s2 = inlined_call_operand.vmem [shape: f32[1,128], index: 2, kind: input, shape index: {}]   ;;  %s263_s3 = inlined_call_operand.vmem [shape: f32[8,128], index: 3, kind: output, shape index: {}]  }
   0x1   :  { %144 = vmatprep.subr.mxu0 %v181_v0  ;;  %v36_v1 = vld [vmem:[%s260_s1 + $0x78] sm:$0xff]  ;;  %v35_v2 = vld [vmem:[%s260_s1 + $0x70] sm:$0xff]  ;;  %176 = vmatprep.mubr.msk.f32.mxu0 %vm182_vm0, %v181_v0  ;;  %v34_v3 = vld [vmem:[%s260_s1 + $0x68] sm:$0xff] }
   0x2   :  { %145 = vmatpush3.msra.mxu0 %v36_v1  ;;  %v33_v4 = vld [vmem:[%s260_s1 + $0x60] sm:$0xff]  ;;  %v32_v5 = vld [vmem:[%s260_s1 + $0x58] sm:$0xff]  ;;  %v31_v6 = vld [vmem:[%s260_s1 + $0x50] sm:$0xff] }
   0x3   :  { %146 = vmatprep.subr.mxu0 %v181_v0  ;;  %v30_v7 = vld [vmem:[%s260_s1 + $0x48] sm:$0xff]  ;;  %v29_v8 = vld [vmem:[%s260_s1 + $0x40] sm:$0xff]  ;;  %v28_v9 = vld [vmem:[%s260_s1 + $0x38] sm:$0xff] }
   0x4   :  { %147 = vmatpush3.msra.mxu0 %v35_v2  ;;  %v27_v10 = vld [vmem:[%s260_s1 + $0x30] sm:$0xff]  ;;  %v26_v11 = vld [vmem:[%s260_s1 + $0x28] sm:$0xff]  ;;  %v25_v12 = vld [vmem:[%s260_s1 + $0x20] sm:$0xff] }
   0x5   :  { %148 = vmatprep.subr.mxu0 %v181_v0  ;;  %v24_v13 = vld [vmem:[%s260_s1 + $0x18] sm:$0xff]  ;;  %v23_v14 = vld [vmem:[%s260_s1 + $0x10] sm:$0xff]  ;;  %v22_v15 = vld [vmem:[%s260_s1 + $0x8] sm:$0xff] }
   0x6   :  { %149 = vmatpush3.msra.mxu0 %v34_v3  ;;  %v21_v16 = vld [vmem:[%s260_s1] sm:$0xff] }
   0x7   :  { %150 = vmatprep.subr.mxu0 %v181_v0  ;;  %v20_v17 = vld [vmem:[%s261_s0] sm:$0xff] }
   0x8   :  { %151 = vmatpush3.msra.mxu0 %v33_v4  ;;  %v126_v18 = vld [vmem:[%s262_s2] ss:$0 sm:$0xff] }
   0x9   :  { %152 = vmatprep.subr.mxu0 %v181_v0 }
   0xa   :  { %153 = vmatpush3.msra.mxu0 %v32_v5 }
   0xb   :  { %154 = vmatprep.subr.mxu0 %v181_v0 }
   0xc   :  { %155 = vmatpush3.msra.mxu0 %v31_v6 }
   0xd   :  { %156 = vmatprep.subr.mxu0 %v181_v0 }
   0xe   :  { %157 = vmatpush3.msra.mxu0 %v30_v7 }
   0xf   :  { %158 = vmatprep.subr.mxu0 %v181_v0 }
  0x10   :  { %159 = vmatpush3.msra.mxu0 %v29_v8 }
  0x11   :  { %160 = vmatprep.subr.mxu0 %v181_v0 }
  0x12   :  { %161 = vmatpush3.msra.mxu0 %v28_v9 }
  0x13   :  { %162 = vmatprep.subr.mxu0 %v181_v0 }
  0x14   :  { %163 = vmatpush3.msra.mxu0 %v27_v10 }
  0x15   :  { %164 = vmatprep.subr.mxu0 %v181_v0 }
  0x16   :  { %165 = vmatpush3.msra.mxu0 %v26_v11 }
  0x17   :  { %166 = vmatprep.subr.mxu0 %v181_v0 }
  0x18   :  { %167 = vmatpush3.msra.mxu0 %v25_v12 }
  0x19   :  { %168 = vmatprep.subr.mxu0 %v181_v0 }
  0x1a   :  { %169 = vmatpush3.msra.mxu0 %v24_v13 }
  0x1b   :  { %170 = vmatprep.subr.mxu0 %v181_v0 }
  0x1c   :  { %171 = vmatpush3.msra.mxu0 %v23_v14 }
  0x1d   :  { %172 = vmatprep.subr.mxu0 %v181_v0 }
  0x1e   :  { %173 = vmatpush3.msra.mxu0 %v22_v15 }
  0x1f   :  { %174 = vmatprep.subr.mxu0 %v181_v0 }
  0x20   :  { %175 = vmatpush3.msra.mxu0 %v21_v16 }
  0x21   :  { %177 = vmatmul.mubr.f32.vlgmr.msra.gmra.mxu0 %v20_v17 }
  0xe1   :  { %v103_v19 = vpop.f32.mrf.mxu0 }
  0xe2   :  { %v120_v20 = vadd.f32 %v126_v18, %v103_v19 }
  0xe3   :  { %v178_v21 = vpop.f32.mrf.mxu0 }
  0xe4   :  { %121 = vst [vmem:[%s263_s3] sm:$0xff] %v120_v20 }

</bundles_post_ra>
